<compile_context>
chip_gen: v7x
topology: tpu7x:2x2x1
jax: 0.10.0
libtpu: 0.0.40
codegen_flags: <defaults>
</compile_context>

<pallas_src>
import functools

import jax
import jax.numpy as jnp
from jax.experimental import pallas as pl
from jax.experimental.pallas import tpu as pltpu


def _round_up(x, m):
    return ((x + m - 1) // m) * m


def _discriminator_kernel(kernel_sizes, fp, seq_len,
                          tok_ref, table_ref, convw_ref, convb_ref,
                          hwg_ref, smalls_ref, out_ref):
    tbl = tok_ref.shape[0]                       # tb * L
    tb = tbl // seq_len
    vocab = table_ref.shape[0]

    # --- Fused embedding lookup: one-hot selection on the MXU (exact). ---
    ids = tok_ref[...]                                               # (tb*L, 1) int32
    lane = jax.lax.broadcasted_iota(jnp.int32, (tbl, vocab), 1)      # (tb*L, V)
    onehot = jnp.where(ids == lane, 1.0, 0.0).astype(jnp.bfloat16)
    emb2d = jnp.dot(onehot, table_ref[...],
                    preferred_element_type=jnp.float32)              # (tb*L, E) f32
    emb2d = emb2d.astype(jnp.bfloat16)                               # exact (table is bf16)

    # --- All conv branches & taps in one MXU matmul. ---
    y = jnp.dot(emb2d, convw_ref[...],
                preferred_element_type=jnp.float32)                  # (tb*L, kmax*Fp)
    y3 = y.reshape(tb, seq_len, convw_ref.shape[1])                  # major-dim split only

    feats = jnp.zeros((tb, fp), dtype=jnp.float32)
    for i, k in enumerate(kernel_sizes):
        l_out = seq_len - k + 1
        acc = y3[:, 0:l_out, 0:fp]                                   # tap 0
        for j in range(1, k):
            acc = acc + y3[:, j:j + l_out, j * fp:(j + 1) * fp]      # 128-aligned lane slices
        # Bias overlay: real bias in this branch's columns, -1e30 elsewhere so
        # relu + maxpool zero out other branches' partial sums.
        acc = acc + convb_ref[i:i + 1, :][:, None, :]
        acc = jnp.maximum(acc, 0.0)                                  # F.relu
        # Branch columns are disjoint overlays, so add == concat.
        feats = feats + jnp.max(acc, axis=1)                         # max_pool1d over full seq

    # --- Fused highway linear + gate: one (Fp, 2Fp) matmul. ---
    z = jnp.dot(feats.astype(jnp.bfloat16), hwg_ref[...],
                preferred_element_type=jnp.float32) + smalls_ref[0:1, :]
    h = jnp.maximum(z[:, :fp], 0.0)
    t = jax.nn.sigmoid(z[:, fp:])
    out = t * h + (1.0 - h) * feats      # matches reference: (1 - h), not (1 - t)
    # TODO(synk): dropout is identity here (inference mode).

    # --- Final Linear(F, 1) as VPU multiply + lane reduction (no N=1 MXU dot). ---
    lin_w = smalls_ref[1:2, 0:fp]                                    # (1, Fp) f32
    lin_b = smalls_ref[2:3, 0:1]                                     # (1, 1)  f32
    out_ref[...] = jnp.sum(out * lin_w, axis=-1, keepdims=True) + lin_b


def discriminator_forward(tokens, packed, kernel_sizes, block_batch=8):
    B, L = tokens.shape
    fp = packed["conv_b_all"].shape[1]
    tb = block_batch if (B % block_batch == 0) else B
    grid = (B // tb,)

    tokens2d = tokens.reshape(B * L, 1).astype(jnp.int32)

    table = packed["embed"]
    conv_w = packed["conv_w_big"]
    conv_b = packed["conv_b_all"]
    hwg_w = packed["hwg_w"]
    smalls = packed["smalls"]

    kernel = functools.partial(_discriminator_kernel, tuple(kernel_sizes), fp, L)

    return pl.pallas_call(
        kernel,
        out_shape=jax.ShapeDtypeStruct((B, 1), jnp.float32),
        grid=grid,
        in_specs=[
            pl.BlockSpec((tb * L, 1), lambda b: (b, 0)),        # batch-tiled token ids
            pl.BlockSpec(table.shape, lambda b: (0, 0)),        # weights: resident blocks
            pl.BlockSpec(conv_w.shape, lambda b: (0, 0)),
            pl.BlockSpec(conv_b.shape, lambda b: (0, 0)),
            pl.BlockSpec(hwg_w.shape, lambda b: (0, 0)),
            pl.BlockSpec(smalls.shape, lambda b: (0, 0)),
        ],
        out_specs=pl.BlockSpec((tb, 1), lambda b: (b, 0)),
        compiler_params=pltpu.CompilerParams(
            dimension_semantics=("parallel",)),
    )(tokens2d, table, conv_w, conv_b, hwg_w, smalls)


def init_params(key, vocab_size, emb_dim, kernel_sizes, num_kernels):
    # Raw parameters, matching the distributions in Discriminator._init_param.
    # Linear/conv weights stored pre-transposed (in, out) for direct matmul.
    feat_dim = sum(num_kernels)
    k_embed, k_rest = jax.random.split(key)
    embed = jax.random.uniform(k_embed, (vocab_size, emb_dim), jnp.float32, -1.0, 1.0)
    embed = embed.at[0].set(0.0)                         # padding_idx=0
    params = {"embed": embed}

    keys = jax.random.split(k_rest, len(kernel_sizes) + 3)
    for i, (ks, nk) in enumerate(zip(kernel_sizes, num_kernels)):
        params[f"conv_w_{i}"] = 0.1 * jax.random.normal(keys[i], (ks, emb_dim, nk), jnp.float32)
        params[f"conv_b_{i}"] = jnp.full((nk,), 0.1, jnp.float32)
    params["hw_w"] = 0.1 * jax.random.normal(keys[-3], (feat_dim, feat_dim), jnp.float32)
    params["hw_b"] = jnp.full((feat_dim,), 0.1, jnp.float32)
    params["hg_w"] = 0.1 * jax.random.normal(keys[-2], (feat_dim, feat_dim), jnp.float32)
    params["hg_b"] = jnp.full((feat_dim,), 0.1, jnp.float32)
    params["lin_w"] = 0.1 * jax.random.normal(keys[-1], (feat_dim, 1), jnp.float32)
    params["lin_b"] = jnp.full((1,), 0.1, jnp.float32)
    return params


def pack_params(params, kernel_sizes, num_kernels, emb_dim):
    # Host-side packing: tap-slotted, lane-padded (128), fused, bf16 matmul weights.
    n_branch = len(kernel_sizes)
    feat_dim = sum(num_kernels)
    fp = _round_up(feat_dim, 128)
    kmax = max(kernel_sizes)

    # Tap j of branch i lives in lane slot [j*fp, (j+1)*fp) at column offset off_i.
    conv_w_big = jnp.zeros((emb_dim, kmax * fp), jnp.float32)
    # Bias: real bias in the branch's columns, -1e30 elsewhere (mask via relu+maxpool).
    conv_b_all = jnp.full((n_branch, fp), -1e30, jnp.float32)
    off = 0
    for i, (k, nk) in enumerate(zip(kernel_sizes, num_kernels)):
        w = params[f"conv_w_{i}"]                         # (k, E, nk)
        for j in range(k):
            conv_w_big = conv_w_big.at[:, j * fp + off:j * fp + off + nk].set(w[j])
        conv_b_all = conv_b_all.at[i, off:off + nk].set(params[f"conv_b_{i}"])
        off += nk

    hwg_w = jnp.zeros((fp, 2 * fp), jnp.float32)
    hwg_w = hwg_w.at[:feat_dim, :feat_dim].set(params["hw_w"])
    hwg_w = hwg_w.at[:feat_dim, fp:fp + feat_dim].set(params["hg_w"])

    smalls = jnp.zeros((3, 2 * fp), jnp.float32)
    smalls = smalls.at[0, :feat_dim].set(params["hw_b"])
    smalls = smalls.at[0, fp:fp + feat_dim].set(params["hg_b"])
    smalls = smalls.at[1, :feat_dim].set(params["lin_w"][:, 0])
    smalls = smalls.at[2, 0].set(params["lin_b"][0])

    return {
        "embed": params["embed"].astype(jnp.bfloat16),
        "conv_w_big": conv_w_big.astype(jnp.bfloat16),
        "conv_b_all": conv_b_all,
        "hwg_w": hwg_w.astype(jnp.bfloat16),
        "smalls": smalls,
    }


def reference_forward(tokens, params, kernel_sizes, num_kernels):
    # Pure-JAX reference mirroring the PyTorch forward.  Matmul operands are
    # rounded to bf16 (like the kernel's MXU inputs); accumulation stays f32.
    def q(x):
        return x.astype(jnp.bfloat16).astype(jnp.float32)

    emb = q(jnp.take(params["embed"], tokens, axis=0))
    L = emb.shape[1]
    feats_list = []
    for i, (k, nk) in enumerate(zip(kernel_sizes, num_kernels)):
        w = q(params[f"conv_w_{i}"])                      # (k, E, nk)
        b = params[f"conv_b_{i}"]                         # (nk,)
        l_out = L - k + 1
        acc = sum(jnp.einsum("ble,ec->blc", emb[:, j:j + l_out, :], w[j])
                  for j in range(k)) + b[None, None, :]
        acc = jax.nn.relu(acc)
        feats_list.append(jnp.max(acc, axis=1))
    feats = jnp.concatenate(feats_list, axis=-1)          # (B, F)
    h = jax.nn.relu(q(feats) @ q(params["hw_w"]) + params["hw_b"][None, :])
    t = jax.nn.sigmoid(q(feats) @ q(params["hg_w"]) + params["hg_b"][None, :])
    out = t * h + (1.0 - h) * feats
    return out @ params["lin_w"] + params["lin_b"][None, :]


if __name__ == "__main__":
    vocab_size = 64
    emb_dim = 16
    kernel_sizes = (2, 3)
    num_kernels = (8, 8)
    batch, seq_len = 16, 8

    key = jax.random.PRNGKey(0)
    k_params, k_tokens = jax.random.split(key)
    params = init_params(k_params, vocab_size, emb_dim, kernel_sizes, num_kernels)
    packed = pack_params(params, kernel_sizes, num_kernels, emb_dim)
    tokens = jax.random.randint(k_tokens, (batch, seq_len), 0, vocab_size, jnp.int32)

    out = discriminator_forward(tokens, packed, kernel_sizes, block_batch=8)
    out = jax.block_until_ready(out)

    ref = reference_forward(tokens, params, kernel_sizes, num_kernels)
    assert out.shape == (batch, 1)
    assert jnp.allclose(out, ref, atol=1e-2, rtol=1e-2), (out, ref)

    print("KERNEL_OK")
</pallas_src>

<mosaic_0001>
module attributes {stable_mosaic.version = 11 : i64} {
  func.func @_discriminator_kernel(%arg0: i32, %arg1: memref<64x1xi32, #tpu.memory_space<vmem>>, %arg2: memref<64x16xbf16, #tpu.memory_space<vmem>>, %arg3: memref<16x384xbf16, #tpu.memory_space<vmem>>, %arg4: memref<2x128xf32, #tpu.memory_space<vmem>>, %arg5: memref<128x256xbf16, #tpu.memory_space<vmem>>, %arg6: memref<3x256xf32, #tpu.memory_space<vmem>>, %arg7: memref<8x1xf32, #tpu.memory_space<vmem>>) attributes {dimension_semantics = [#tpu.dimension_semantics<parallel>], iteration_bounds = array<i64: 2>, scalar_prefetch = 0 : i64, scratch_operands = 0 : i64, tpu.core_type = #tpu.core_type<tc>, window_params = [{transform_indices = @transform_0, window_bounds = array<i64: 64, 1>}, {pipeline_mode = #tpu.pipeline_mode<synchronous>, transform_indices = @transform_1, window_bounds = array<i64: 64, 16>}, {pipeline_mode = #tpu.pipeline_mode<synchronous>, transform_indices = @transform_2, window_bounds = array<i64: 16, 384>}, {pipeline_mode = #tpu.pipeline_mode<synchronous>, transform_indices = @transform_3, window_bounds = array<i64: 2, 128>}, {pipeline_mode = #tpu.pipeline_mode<synchronous>, transform_indices = @transform_4, window_bounds = array<i64: 128, 256>}, {pipeline_mode = #tpu.pipeline_mode<synchronous>, transform_indices = @transform_5, window_bounds = array<i64: 3, 256>}, {transform_indices = @transform_6, window_bounds = array<i64: 8, 1>}]} {
    %c0 = arith.constant 0 : index
    %c0_0 = arith.constant 0 : index
    %0 = vector.load %arg1[%c0, %c0_0] : memref<64x1xi32, #tpu.memory_space<vmem>>, vector<64x1xi32>
    %1 = tpu.iota {dimensions = array<i32: 1>} : vector<64x64xi32>
    %2 = vector.broadcast %0 : vector<64x1xi32> to vector<64x64xi32>
    %3 = arith.cmpi eq, %2, %1 : vector<64x64xi32>
    %cst = arith.constant 1.000000e+00 : f32
    %cst_1 = arith.constant 0.000000e+00 : f32
    %4 = vector.broadcast %cst : f32 to vector<64x64xf32>
    %5 = vector.broadcast %cst_1 : f32 to vector<64x64xf32>
    %6 = arith.select %3, %4, %5 : vector<64x64xi1>, vector<64x64xf32>
    %7 = arith.truncf %6 : vector<64x64xf32> to vector<64x64xbf16>
    %c0_2 = arith.constant 0 : index
    %c0_3 = arith.constant 0 : index
    %8 = vector.load %arg2[%c0_2, %c0_3] : memref<64x16xbf16, #tpu.memory_space<vmem>>, vector<64x16xbf16>
    %cst_4 = arith.constant dense<0.000000e+00> : vector<64x16xf32>
    %9 = tpu.matmul %7, %8, %cst_4 {dimension_numbers = #tpu.dot_dimension_numbers<[1], [0], [0], [1], [0, 0, 1, 1], [], []>} : vector<64x64xbf16>, vector<64x16xbf16>, vector<64x16xf32> -> vector<64x16xf32>
    %10 = arith.truncf %9 : vector<64x16xf32> to vector<64x16xbf16>
    %c0_5 = arith.constant 0 : index
    %c0_6 = arith.constant 0 : index
    %11 = vector.load %arg3[%c0_5, %c0_6] : memref<16x384xbf16, #tpu.memory_space<vmem>>, vector<16x384xbf16>
    %cst_7 = arith.constant dense<0.000000e+00> : vector<64x384xf32>
    %12 = tpu.matmul %10, %11, %cst_7 {dimension_numbers = #tpu.dot_dimension_numbers<[1], [0], [0], [1], [0, 0, 1, 1], [], []>} : vector<64x16xbf16>, vector<16x384xbf16>, vector<64x384xf32> -> vector<64x384xf32>
    %13 = vector.shape_cast %12 : vector<64x384xf32> to vector<8x8x384xf32>
    %cst_8 = arith.constant 0.000000e+00 : f32
    %14 = vector.broadcast %cst_8 : f32 to vector<8x128xf32>
    %15 = vector.extract_strided_slice %13 {offsets = [0, 0, 0], sizes = [8, 7, 128], strides = [1, 1, 1]} : vector<8x8x384xf32> to vector<8x7x128xf32>
    %16 = vector.extract_strided_slice %13 {offsets = [0, 1, 128], sizes = [8, 7, 128], strides = [1, 1, 1]} : vector<8x8x384xf32> to vector<8x7x128xf32>
    %17 = arith.addf %15, %16 : vector<8x7x128xf32>
    %c0_9 = arith.constant 0 : index
    %c0_10 = arith.constant 0 : index
    %18 = vector.load %arg4[%c0_9, %c0_10] : memref<2x128xf32, #tpu.memory_space<vmem>>, vector<1x128xf32>
    %19 = vector.shape_cast %18 : vector<1x128xf32> to vector<1x1x128xf32>
    %20 = vector.broadcast %19 : vector<1x1x128xf32> to vector<8x7x128xf32>
    %21 = arith.addf %17, %20 : vector<8x7x128xf32>
    %cst_11 = arith.constant 0.000000e+00 : f32
    %22 = vector.broadcast %cst_11 : f32 to vector<8x7x128xf32>
    %23 = arith.maximumf %21, %22 : vector<8x7x128xf32>
    %cst_12 = arith.constant dense<0xFF800000> : vector<8x128xf32>
    %24 = vector.multi_reduction <maximumf>, %23, %cst_12 [1] : vector<8x7x128xf32> to vector<8x128xf32>
    %25 = arith.addf %14, %24 : vector<8x128xf32>
    %26 = vector.extract_strided_slice %13 {offsets = [0, 0, 0], sizes = [8, 6, 128], strides = [1, 1, 1]} : vector<8x8x384xf32> to vector<8x6x128xf32>
    %27 = vector.extract_strided_slice %13 {offsets = [0, 1, 128], sizes = [8, 6, 128], strides = [1, 1, 1]} : vector<8x8x384xf32> to vector<8x6x128xf32>
    %28 = arith.addf %26, %27 : vector<8x6x128xf32>
    %29 = vector.extract_strided_slice %13 {offsets = [0, 2, 256], sizes = [8, 6, 128], strides = [1, 1, 1]} : vector<8x8x384xf32> to vector<8x6x128xf32>
    %30 = arith.addf %28, %29 : vector<8x6x128xf32>
    %c1 = arith.constant 1 : index
    %c0_13 = arith.constant 0 : index
    %31 = vector.load %arg4[%c1, %c0_13] : memref<2x128xf32, #tpu.memory_space<vmem>>, vector<1x128xf32>
    %32 = vector.shape_cast %31 : vector<1x128xf32> to vector<1x1x128xf32>
    %33 = vector.broadcast %32 : vector<1x1x128xf32> to vector<8x6x128xf32>
    %34 = arith.addf %30, %33 : vector<8x6x128xf32>
    %cst_14 = arith.constant 0.000000e+00 : f32
    %35 = vector.broadcast %cst_14 : f32 to vector<8x6x128xf32>
    %36 = arith.maximumf %34, %35 : vector<8x6x128xf32>
    %cst_15 = arith.constant dense<0xFF800000> : vector<8x128xf32>
    %37 = vector.multi_reduction <maximumf>, %36, %cst_15 [1] : vector<8x6x128xf32> to vector<8x128xf32>
    %38 = arith.addf %25, %37 : vector<8x128xf32>
    %39 = arith.truncf %38 : vector<8x128xf32> to vector<8x128xbf16>
    %c0_16 = arith.constant 0 : index
    %c0_17 = arith.constant 0 : index
    %40 = vector.load %arg5[%c0_16, %c0_17] : memref<128x256xbf16, #tpu.memory_space<vmem>>, vector<128x256xbf16>
    %cst_18 = arith.constant dense<0.000000e+00> : vector<8x256xf32>
    %41 = tpu.matmul %39, %40, %cst_18 {dimension_numbers = #tpu.dot_dimension_numbers<[1], [0], [0], [1], [0, 0, 1, 1], [], []>} : vector<8x128xbf16>, vector<128x256xbf16>, vector<8x256xf32> -> vector<8x256xf32>
    %c0_19 = arith.constant 0 : index
    %c0_20 = arith.constant 0 : index
    %42 = vector.load %arg6[%c0_19, %c0_20] : memref<3x256xf32, #tpu.memory_space<vmem>>, vector<1x256xf32>
    %43 = vector.broadcast %42 : vector<1x256xf32> to vector<8x256xf32>
    %44 = arith.addf %41, %43 : vector<8x256xf32>
    %45 = vector.extract_strided_slice %44 {offsets = [0, 0], sizes = [8, 128], strides = [1, 1]} : vector<8x256xf32> to vector<8x128xf32>
    %cst_21 = arith.constant 0.000000e+00 : f32
    %46 = vector.broadcast %cst_21 : f32 to vector<8x128xf32>
    %47 = arith.maximumf %45, %46 : vector<8x128xf32>
    %48 = vector.extract_strided_slice %44 {offsets = [0, 128], sizes = [8, 128], strides = [1, 1]} : vector<8x256xf32> to vector<8x128xf32>
    %49 = arith.negf %48 : vector<8x128xf32>
    %50 = math.exp %49 : vector<8x128xf32>
    %cst_22 = arith.constant 1.000000e+00 : f32
    %51 = vector.broadcast %cst_22 : f32 to vector<8x128xf32>
    %52 = arith.addf %51, %50 : vector<8x128xf32>
    %53 = arith.divf %51, %52 : vector<8x128xf32>
    %54 = arith.mulf %53, %47 : vector<8x128xf32>
    %cst_23 = arith.constant 1.000000e+00 : f32
    %55 = vector.broadcast %cst_23 : f32 to vector<8x128xf32>
    %56 = arith.subf %55, %47 : vector<8x128xf32>
    %57 = arith.mulf %56, %38 : vector<8x128xf32>
    %58 = arith.addf %54, %57 : vector<8x128xf32>
    %c1_24 = arith.constant 1 : index
    %c0_25 = arith.constant 0 : index
    %59 = vector.load %arg6[%c1_24, %c0_25] : memref<3x256xf32, #tpu.memory_space<vmem>>, vector<1x128xf32>
    %c2 = arith.constant 2 : index
    %c0_26 = arith.constant 0 : index
    %60 = vector.load %arg6[%c2, %c0_26] : memref<3x256xf32, #tpu.memory_space<vmem>>, vector<1x1xf32>
    %61 = vector.broadcast %59 : vector<1x128xf32> to vector<8x128xf32>
    %62 = arith.mulf %58, %61 : vector<8x128xf32>
    %cst_27 = arith.constant dense<0.000000e+00> : vector<8xf32>
    %63 = vector.multi_reduction <add>, %62, %cst_27 [1] : vector<8x128xf32> to vector<8xf32>
    %64 = vector.shape_cast %63 : vector<8xf32> to vector<8x1xf32>
    %65 = vector.broadcast %60 : vector<1x1xf32> to vector<8x1xf32>
    %66 = arith.addf %64, %65 : vector<8x1xf32>
    %c0_28 = arith.constant 0 : index
    %c0_29 = arith.constant 0 : index
    %67 = vector.load %arg7[%c0_28, %c0_29] : memref<8x1xf32, #tpu.memory_space<vmem>>, vector<8x1xf32>
    tpu.vector_store %arg7[%c0_28, %c0_29], %66 {strides = array<i32>} : memref<8x1xf32, #tpu.memory_space<vmem>>, vector<8x1xf32>,
    return
  }
  func.func @transform_0(%arg0: i32) -> (i32, i32) {
    %c0_i32 = arith.constant 0 : i32
    %c0_i32_0 = arith.constant 0 : i32
    return %arg0, %c0_i32 : i32, i32
  }
  func.func @transform_1(%arg0: i32) -> (i32, i32) {
    %c0_i32 = arith.constant 0 : i32
    %c0_i32_0 = arith.constant 0 : i32
    %c0_i32_1 = arith.constant 0 : i32
    return %c0_i32, %c0_i32_0 : i32, i32
  }
  func.func @transform_2(%arg0: i32) -> (i32, i32) {
    %c0_i32 = arith.constant 0 : i32
    %c0_i32_0 = arith.constant 0 : i32
    %c0_i32_1 = arith.constant 0 : i32
    return %c0_i32, %c0_i32_0 : i32, i32
  }
  func.func @transform_3(%arg0: i32) -> (i32, i32) {
    %c0_i32 = arith.constant 0 : i32
    %c0_i32_0 = arith.constant 0 : i32
    %c0_i32_1 = arith.constant 0 : i32
    return %c0_i32, %c0_i32_0 : i32, i32
  }
  func.func @transform_4(%arg0: i32) -> (i32, i32) {
    %c0_i32 = arith.constant 0 : i32
    %c0_i32_0 = arith.constant 0 : i32
    %c0_i32_1 = arith.constant 0 : i32
    return %c0_i32, %c0_i32_0 : i32, i32
  }
  func.func @transform_5(%arg0: i32) -> (i32, i32) {
    %c0_i32 = arith.constant 0 : i32
    %c0_i32_0 = arith.constant 0 : i32
    %c0_i32_1 = arith.constant 0 : i32
    return %c0_i32, %c0_i32_0 : i32, i32
  }
  func.func @transform_6(%arg0: i32) -> (i32, i32) {
    %c0_i32 = arith.constant 0 : i32
    %c0_i32_0 = arith.constant 0 : i32
    return %arg0, %c0_i32 : i32, i32
  }
}

</mosaic_0001>

<bundles_post_ra>
// kernel: tpu_custom_call.1
= control target key start
LH: loop header
LB: loop body
LE: loop exit
PB: predicated region body
PF: predicated region fallthrough
CT: control target
= control target key end

     0   :  { %s1295_s21 = smov 0   ;;  %s1495_s0 = inlined_call_operand.vmem [shape: s32[128,1], index: 0, kind: input, shape index: {}]   ;;  %s1496_s1 = inlined_call_operand.vmem [shape: bf16[64,16], index: 1, kind: input, shape index: {}]   ;;  %s1497_s2 = inlined_call_operand.vmem [shape: bf16[16,384], index: 2, kind: input, shape index: {}]   ;;  %s1498_s3 = inlined_call_operand.vmem [shape: f32[2,128], index: 3, kind: input, shape index: {}]   ;;  %s1499_s4 = inlined_call_operand.vmem [shape: bf16[128,256], index: 4, kind: input, shape index: {}]   ;;  %s1500_s5 = inlined_call_operand.vmem [shape: f32[3,256], index: 5, kind: input, shape index: {}]   ;;  %s1501_s6 = inlined_call_operand.vmem [shape: f32[16,1], index: 6, kind: output, shape index: {}]  }
   0x1 LB: > { %s1301_s22 = sadd.s32 4294967295, %s1256_s21   ;;  %p1117_p0 = scmp.ge.s32.totalorder %s1256_s21, 1  ;;  %s1256_s21 = sphi %s1295_s21, %s16_s21  }
   0x2   : > { %p213_p1 = scmp.lt.s32.totalorder %s1256_s21, 3 }
   0x4   : > { %p214_p2 = pnand %p1117_p0, %p213_p1 }
   0x5   : > { %s1118_s23 = sshll.u32 (!%p214_p2), %s1301_s22, 3  ;;  %v1258_v0 = vmov (!%p214_p2), 0   ;;  %v1214_v1 = vld [vmem:[%s1496_s1] sm:$0xff] (!%p214_p2)   ;;  %v1215_v2 = vld [vmem:[%s1496_s1 + $0x8] sm:$0xff] (!%p214_p2)   ;;  %v1216_v7 = vld [vmem:[%s1496_s1 + $0x10] sm:$0xff] (!%p214_p2)   ;;  %v261_v13 = vlaneseq (!%p214_p2)  ;;  %vm339_vm4 = vcmask (!%p214_p2), 523264  }
   0x6   : > { %217 = sbr.rel (%p214_p2) target bundleno = 1049 (0x419), region = 44  ;;  %1213 = vset.pattern.permute.xlu1 (!%p214_p2), %v1258_v0  ;;  %1212 = vset.pattern.permute.xlu0 (!%p214_p2), %v1258_v0  ;;  %p243_p3 = scmp.lt.s32.totalorder (!%p214_p2), %s1118_s23, 15  ;;  %v1217_v9 = vld [vmem:[%s1496_s1 + $0x18] sm:$0xff] (!%p214_p2)   ;;  %v1259_v19 = vmov (!%p214_p2), 0.0   ;;  %v1218_v36 = vld [vmem:[%s1497_s2 + $0x4] ss:$12 sps:$4 sm:$0xff] (!%p214_p2)  }
   0x7   : > { %486 = vmatprep.mubr.bf16.mxu1 (!%p214_p2), %v1258_v0  ;;  %1176 = vmatprep.subr.bf16.mxu0 (!%p214_p2), %v1214_v1  ;;  %v262_v14 = vand.u32 (!%p214_p2), 127, %v261_v13  ;;  %v1220_v37 = vld [vmem:[%s1497_s2] ss:$12 sps:$4 sm:$0xff] (!%p214_p2)   ;;  %v1221_v38 = vld [vmem:[%s1497_s2 + $0x8] ss:$12 sps:$4 sm:$0xff] (!%p214_p2)   ;;  %vm441_vm9 = vcmask (!%p214_p2), 130048  }
   0x8   : > { %1177 = vmatpush3.bf16.msra.mxu0 (!%p214_p2), %v1214_v1  ;;  %454 = vmatprep.subr.bf16.mxu1 (!%p214_p2), %v1218_v36  ;;  %v1224_v51 = vld [vmem:[%s1499_s4 + $0x4] ss:$8 sps:$4 sm:$0xff] (!%p214_p2)   ;;  %v1222_v52 = vld [vmem:[%s1499_s4] ss:$8 sps:$4 sm:$0xff] (!%p214_p2)   ;;  %v1227_v53 = vld [vmem:[%s1499_s4 + $0x14] ss:$8 sps:$4 sm:$0xff] (!%p214_p2)  }
   0x9   : > { %1178 = vmatprep.subr.bf16.mxu0 (!%p214_p2), %v1215_v2  ;;  %455 = vmatpush1.bf16.msra.mxu1 (!%p214_p2), %v1220_v37  ;;  %v1225_v54 = vld [vmem:[%s1499_s4 + $0x10] ss:$8 sps:$4 sm:$0xff] (!%p214_p2)   ;;  %v1230_v55 = vld [vmem:[%s1499_s4 + $0x24] ss:$8 sps:$4 sm:$0xff] (!%p214_p2)   ;;  %v1228_v56 = vld [vmem:[%s1499_s4 + $0x20] ss:$8 sps:$4 sm:$0xff] (!%p214_p2)  }
   0xa   : > { %976 = vmatprep.subr.bf16.mxu1 (!%p214_p2), %v1224_v51  ;;  %v1233_v57 = vld [vmem:[%s1499_s4 + $0x34] ss:$8 sps:$4 sm:$0xff] (!%p214_p2)   ;;  %v1231_v58 = vld [vmem:[%s1499_s4 + $0x30] ss:$8 sps:$4 sm:$0xff] (!%p214_p2)   ;;  %v1236_v59 = vld [vmem:[%s1499_s4 + $0x44] ss:$8 sps:$4 sm:$0xff] (!%p214_p2)  }
   0xb   : > { %v1234_v60 = vld [vmem:[%s1499_s4 + $0x40] ss:$8 sps:$4 sm:$0xff] (!%p214_p2)   ;;  %v1239_v61 = vld [vmem:[%s1499_s4 + $0x54] ss:$8 sps:$4 sm:$0xff] (!%p214_p2)   ;;  %v1237_v62 = vld [vmem:[%s1499_s4 + $0x50] ss:$8 sps:$4 sm:$0xff] (!%p214_p2)  }
   0xc   : > { %1179 = vmatpush3.bf16.msra.mxu0 (!%p214_p2), %v1215_v2  ;;  %v1242_v63 = vld [vmem:[%s1499_s4 + $0x64] ss:$8 sps:$4 sm:$0xff] (!%p214_p2)   ;;  %v1245_v1 = vld [vmem:[%s1499_s4 + $0x74] ss:$8 sps:$4 sm:$0xff] (!%p214_p2)   ;;  %v1243_v2 = vld [vmem:[%s1499_s4 + $0x70] ss:$8 sps:$4 sm:$0xff] (!%p214_p2)  }
   0xd   : > { %s1503_s23 = smov (!%p243_p3, %s1118_s23), 15  ;;  %1180 = vmatprep.subr.bf16.mxu0 %v1216_v7  ;;  %vm645_vm10 = vcmask 1046528   ;;  %vm763_vm11 = vcmask 1045504   ;;  %vm880_vm12 = vcmask 1041409   ;;  %vm882_vm13 = vcmask 1042434   ;;  %p248_p4 = scmp.lt.s32.totalorder %s1301_s22, 1 }
   0xe   : > { %s1119_s28 = sshll.u32 %s1503_s23, 3  ;;  %vm884_vm14 = vcmask 1043459   ;;  %vm886_vm15 = vcmask 1044484  }
   0xf   : > { %s246_s7 = scalar_lea.vmem %s1495_s0, %s1119_s28  ;;  %s1505_s22 = smov (!%p248_p4, %s1301_s22), 1 }
  0x10   : > { %v255_v3 = vld [vmem:[%s246_s7 + $0x10] sm:$0xff]  ;;  %v253_v4 = vld [vmem:[%s246_s7] sm:$0xff]  ;;  %v256_v5 = vld [vmem:[%s246_s7 + $0x18] sm:$0xff]  ;;  %1181 = vmatpush3.bf16.msra.mxu0 %v1216_v7  ;;  %s1120_s14 = sshll.u32 %s1505_s22, 3 }
  0x11   : > { %270 = vperm.xlu1 %1213, %v255_v3   ;;  %264 = vperm.xlu0 %1212, %v253_v4   ;;  %v254_v6 = vld [vmem:[%s246_s7 + $0x8] sm:$0xff]  ;;  %v257_v10 = vld [vmem:[%s246_s7 + $0x20] sm:$0xff]  ;;  %v260_v11 = vld [vmem:[%s246_s7 + $0x38] sm:$0xff]  ;;  %s251_s19 = scalar_lea.vmem %s1501_s6, %s1120_s14 }
  0x12   : > { %v258_v8 = vld [vmem:[%s246_s7 + $0x28] sm:$0xff]  ;;  %1182 = vmatprep.subr.bf16.mxu0 %v1217_v9  ;;  %v259_v12 = vld [vmem:[%s246_s7 + $0x30] sm:$0xff] }
  0x14   : > { %1183 = vmatpush3.bf16.msra.mxu0 %v1217_v9  ;;  %v1401_v9 = vld [vmem:[%s1498_s3] ss:$0 sm:$0xff] }
  0x15   : > { %273 = vperm.xlu1 %1213, %v256_v5   ;;  %267 = vperm.xlu0 %1212, %v254_v6  }
  0x16   : > { %1192 = vmatprep.subr.bf16.mxu0 %v1221_v38 }
  0x19   : > { %279 = vperm.xlu1 %1213, %v258_v8   ;;  %276 = vperm.xlu0 %1212, %v257_v10  }
  0x1d   : > { %285 = vperm.xlu1 %1213, %v260_v11   ;;  %282 = vperm.xlu0 %1212, %v259_v12  }
  0x90   : > { %v271_v15 = vpop.permute.xlu1 %270  ;;  %v265_v16 = vpop.permute.xlu0 %264 }
  0x91   : > { %vm289_vm0 = vcmp.eq.s32.totalorder %v271_v15, %v262_v14  ;;  %vm287_vm1 = vcmp.eq.s32.totalorder %v265_v16, %v262_v14 }
  0x92   : > { %v297_v20 = vsel %vm289_vm0, 1.0, %v1259_v19  ;;  %v295_v21 = vsel %vm287_vm1, 1.0, %v1259_v19  ;;  %vm888_vm0 = vcmask 1045509   ;;  %vm890_vm1 = vcmask 1046534  }
  0x94   : > { %v274_v17 = vpop.permute.xlu1 %273  ;;  %v268_v18 = vpop.permute.xlu0 %267 }
  0x95   : > { %vm290_vm2 = vcmp.eq.s32.totalorder %v274_v17, %v262_v14  ;;  %vm288_vm3 = vcmp.eq.s32.totalorder %v268_v18, %v262_v14  ;;  %v1406_v17 = vld [vmem:[%s1498_s3 + $0x1] ss:$0 sm:$0xff] }
  0x96   : > { %v298_v22 = vsel %vm290_vm2, 1.0, %v1259_v19  ;;  %v296_v23 = vsel %vm288_vm3, 1.0, %v1259_v19  ;;  %vm892_vm2 = vcmask 1047559   ;;  %vm1058_vm3 = vcmask 7168  }
  0x97   : > { %v304_v24 = vpack.c.bf16 %v298_v22, %v297_v20  ;;  %v303_v25 = vpack.c.bf16 %v296_v23, %v295_v21 }
  0x98   : > { %v280_v26 = vpop.permute.xlu1 %279  ;;  %v277_v27 = vpop.permute.xlu0 %276 }
  0x99   : > { %vm292_vm5 = vcmp.eq.s32.totalorder %v280_v26, %v262_v14  ;;  %vm291_vm6 = vcmp.eq.s32.totalorder %v277_v27, %v262_v14  ;;  %1184 = vmatprep.mubr.msk.bf16.mxu0 %vm339_vm4, %v303_v25 }
  0x9a   : > { %v300_v28 = vsel %vm292_vm5, 1.0, %v1259_v19  ;;  %v299_v29 = vsel %vm291_vm6, 1.0, %v1259_v19  ;;  %1185 = vmatmul.mubr.msk.bf16.vlgmr.msra.gmra.mrb[0].mxu0 %vm339_vm4, %v304_v24 }
  0x9b   : > { %v305_v30 = vpack.c.bf16 %v300_v28, %v299_v29  ;;  %1193 = vmatpush3.bf16.msra.mxu0 %v1221_v38 }
  0x9c   : > { %v286_v31 = vpop.permute.xlu1 %285  ;;  %v283_v32 = vpop.permute.xlu0 %282 }
  0x9d   : > { %vm294_vm7 = vcmp.eq.s32.totalorder %v286_v31, %v262_v14  ;;  %vm293_vm8 = vcmp.eq.s32.totalorder %v283_v32, %v262_v14  ;;  %1188 = vmatprep.mubr.msk.bf16.mxu0 %vm339_vm4, %v305_v30 }
  0x9e   : > { %v302_v33 = vsel %vm294_vm7, 1.0, %v1259_v19  ;;  %v301_v34 = vsel %vm293_vm8, 1.0, %v1259_v19 }
  0x9f   : > { %v306_v35 = vpack.c.bf16 %v302_v33, %v301_v34 }
  0xa2   : > { %1189 = vmatmul.mubr.msk.bf16.gmra.mrb[4].mxu0 %vm339_vm4, %v306_v35 }
 0x16d   : > { %v1186_v39 = vpop.f32.mrb[0].mxu0 }
 0x16e   : > { %v386_v40 = vpop.f32.mrb[1].mxu0 }
 0x16f   : > { %v1187_v41 = vpop.f32.mrb[2].mxu0 }
 0x170   : > { %v418_v42 = vpack.c.bf16 %v1187_v41, %v1186_v39  ;;  %v389_v43 = vpop.f32.mrb[3].mxu0 }
 0x171   : > { %v417_v44 = vpack.c.bf16 %v389_v43, %v386_v40 }
 0x173   : > { %1132 = vmatmul.mubr.msk.bf16.vlgmr.msra.gmra.mrb[0].mxu1 %vm441_vm9, %v417_v44  ;;  %1194 = vmatprep.mubr.msk.bf16.mxu0 %vm441_vm9, %v417_v44 }
 0x174   : > { %1195 = vmatmul.mubr.msk.bf16.vlgmr.msra.gmra.mrb[8].mxu0 %vm441_vm9, %v418_v42  ;;  %496 = vmatprep.mubr.bf16.mxu1 %v1258_v0 }
 0x175   : > { %v1190_v45 = vpop.f32.mrb[4].mxu0  ;;  %977 = vmatpush1.bf16.msra.mxu1 %v1222_v52 }
 0x176   : > { %v402_v46 = vpop.f32.mrb[5].mxu0  ;;  %978 = vmatprep.subr.bf16.mxu1 %v1227_v53 }
 0x177   : > { %v1191_v47 = vpop.f32.mrb[6].mxu0 }
 0x178   : > { %v420_v48 = vpack.c.bf16 %v1191_v47, %v1190_v45  ;;  %v405_v49 = vpop.f32.mrb[7].mxu0 }
 0x179   : > { %v419_v50 = vpack.c.bf16 %v405_v49, %v402_v46  ;;  %979 = vmatpush1.bf16.msra.mxu1 %v1225_v54 }
 0x17a   : > { %980 = vmatprep.subr.bf16.mxu1 %v1230_v55 }
 0x17b   : > { %1133 = vmatmul.mubr.msk.bf16.gmra.mrb[4].mxu1 %vm441_vm9, %v418_v42  ;;  %1198 = vmatprep.mubr.msk.bf16.mxu0 %vm441_vm9, %v419_v50 }
 0x17c   : > { %1199 = vmatmul.mubr.msk.bf16.gmra.mrb[12].mxu0 %vm441_vm9, %v420_v48  ;;  %506 = vmatprep.mubr.bf16.mxu1 %v1258_v0 }
 0x17d   : > { %981 = vmatpush1.bf16.msra.mxu1 %v1228_v56 }
 0x17e   : > { %982 = vmatprep.subr.bf16.mxu1 %v1233_v57 }
 0x181   : > { %983 = vmatpush1.bf16.msra.mxu1 %v1231_v58 }
 0x182   : > { %984 = vmatprep.subr.bf16.mxu1 %v1236_v59 }
 0x183   : > { %1134 = vmatmul.mubr.msk.bf16.gmra.mrb[8].mxu1 %vm441_vm9, %v419_v50 }
 0x184   : > { %516 = vmatprep.mubr.bf16.mxu1 %v1258_v0 }
 0x185   : > { %985 = vmatpush1.bf16.msra.mxu1 %v1234_v60 }
 0x186   : > { %986 = vmatprep.subr.bf16.mxu1 %v1239_v61 }
 0x189   : > { %987 = vmatpush1.bf16.msra.mxu1 %v1237_v62 }
 0x18a   : > { %988 = vmatprep.subr.bf16.mxu1 %v1242_v63 }
 0x18b   : > { %1135 = vmatmul.mubr.msk.bf16.gmra.mrb[12].mxu1 %vm441_vm9, %v420_v48 }
 0x18c   : > { %1008 = vmatprep.mubr.bf16.mxu1 %v1258_v0  ;;  %v1240_v0 = vld [vmem:[%s1499_s4 + $0x60] ss:$8 sps:$4 sm:$0xff]  }
 0x18d   : > { %989 = vmatpush1.bf16.msra.mxu1 %v1240_v0 }
 0x18e   : > { %990 = vmatprep.subr.bf16.mxu1 %v1245_v1 }
 0x191   : > { %991 = vmatpush1.bf16.msra.mxu1 %v1243_v2 }
 0x246   : > { %v488_v3 = vpop.f32.mrb[0].mxu1 }
 0x247   : > { %v490_v4 = vpop.f32.mrb[1].mxu1  ;;  %v1196_v5 = vpop.f32.mrb[8].mxu0 }
 0x248   : > { %v600_v6 = vrot.slane %v490_v4, 1  ;;  %v492_v7 = vpop.f32.mrb[2].mxu1  ;;  %v561_v8 = vpop.f32.mrb[9].mxu0  ;;  %v720_v27 = vrot.slane %v1196_v5, 2 }
 0x249   : > { %v718_v10 = vrot.slane %v561_v8, 2  ;;  %v494_v11 = vpop.f32.mrb[3].mxu1  ;;  %v1197_v12 = vpop.f32.mrb[10].mxu0 }
 0x24a   : > { %v616_v14 = vadd.f32 %v600_v6, %v488_v3  ;;  %v601_v15 = vrot.slane %v494_v11, 1  ;;  %v564_v16 = vpop.f32.mrb[11].mxu0  ;;  %v721_v37 = vrot.slane %v1197_v12, 2 }
 0x24b   : > { %v719_v18 = vrot.slane %v564_v16, 2 }
 0x24c   : > { %v629_v19 = vadd.f32 %v1401_v9, %v616_v14  ;;  %v734_v20 = vadd.f32 %v718_v10, %v616_v14  ;;  %v617_v21 = vadd.f32 %v601_v15, %v492_v7 }
 0x24e   : > { %v637_v22 = vmax.f32 %v629_v19, 0.0  ;;  %v747_v23 = vadd.f32 %v1406_v17, %v734_v20  ;;  %v630_v24 = vadd.f32 %v1401_v9, %v617_v21  ;;  %v735_v25 = vadd.f32 %v719_v18, %v617_v21  ;;  %v498_v26 = vpop.f32.mrb[4].mxu1 }
 0x24f   : > { %v500_v28 = vpop.f32.mrb[5].mxu1  ;;  %v1411_v29 = vpop.f32.mrb[12].mxu0 }
 0x250   : > { %v646_v30 = vsel %vm645_vm10, %v637_v22, -inf  ;;  %v755_v31 = vmax.f32 %v747_v23, 0.0  ;;  %v638_v32 = vmax.f32 %v630_v24, 0.0  ;;  %v748_v33 = vadd.f32 %v1406_v17, %v735_v25  ;;  %v502_v34 = vpop.f32.mrb[6].mxu1  ;;  %v1415_v35 = vpop.f32.mrb[13].mxu0 }
 0x251   : > { %v647_v36 = vrot.slane %v646_v30, 4  ;;  %v602_v38 = vrot.slane %v500_v28, 1  ;;  %v724_v39 = vrot.slane %v1411_v29, 2  ;;  %v504_v40 = vpop.f32.mrb[7].mxu1  ;;  %v1418_v41 = vpop.f32.mrb[14].mxu0  ;;  %v722_v52 = vrot.slane %v1415_v35, 2 }
 0x252   : > { %v764_v42 = vsel %vm763_vm11, %v755_v31, -inf  ;;  %v653_v43 = vsel %vm645_vm10, %v638_v32, -inf  ;;  %v756_v44 = vmax.f32 %v748_v33, 0.0  ;;  %v603_v45 = vrot.slane %v504_v40, 1  ;;  %v1422_v46 = vpop.f32.mrb[15].mxu0 }
 0x253   : > { %v648_v47 = vmax.f32 %v646_v30, %v647_v36  ;;  %v765_v48 = vrot.slane %v764_v42, 4  ;;  %v654_v49 = vrot.slane %v653_v43, 4  ;;  %v618_v50 = vadd.f32 %v602_v38, %v498_v26 }
 0x254   : > { %v771_v51 = vsel %vm763_vm11, %v756_v44, -inf  ;;  %v619_v53 = vadd.f32 %v603_v45, %v502_v34  ;;  %v723_v54 = vrot.slane %v1422_v46, 2 }
 0x255   : > { %v649_v55 = vrot.slane %v648_v47, 2  ;;  %v766_v56 = vmax.f32 %v764_v42, %v765_v48  ;;  %v655_v57 = vmax.f32 %v653_v43, %v654_v49  ;;  %v772_v58 = vrot.slane %v771_v51, 4 }
 0x256   : > { %v631_v59 = vadd.f32 %v1401_v9, %v618_v50  ;;  %v736_v60 = vadd.f32 %v720_v27, %v618_v50  ;;  %v632_v61 = vadd.f32 %v1401_v9, %v619_v53  ;;  %v737_v62 = vadd.f32 %v721_v37, %v619_v53  ;;  %v508_v63 = vpop.f32.mrb[8].mxu1 }
 0x257   : > { %v650_v0 = vmax.f32 %v648_v47, %v649_v55  ;;  %v767_v1 = vrot.slane %v766_v56, 2  ;;  %v656_v2 = vrot.slane %v655_v57, 2  ;;  %v773_v3 = vmax.f32 %v771_v51, %v772_v58  ;;  %v510_v4 = vpop.f32.mrb[9].mxu1 }
 0x258   : > { %v639_v5 = vmax.f32 %v631_v59, 0.0  ;;  %v749_v6 = vadd.f32 %v1406_v17, %v736_v60  ;;  %v640_v7 = vmax.f32 %v632_v61, 0.0  ;;  %v750_v8 = vadd.f32 %v1406_v17, %v737_v62  ;;  %v512_v10 = vpop.f32.mrb[10].mxu1 }
 0x259   : > { %v651_v11 = vrot.slane %v650_v0, 1  ;;  %v768_v12 = vmax.f32 %v766_v56, %v767_v1  ;;  %v657_v14 = vmax.f32 %v655_v57, %v656_v2  ;;  %v774_v15 = vrot.slane %v773_v3, 2  ;;  %v514_v16 = vpop.f32.mrb[11].mxu1 }
 0x25a   : > { %v660_v18 = vsel %vm645_vm10, %v639_v5, -inf  ;;  %v757_v19 = vmax.f32 %v749_v6, 0.0  ;;  %v667_v20 = vsel %vm645_vm10, %v640_v7, -inf  ;;  %v758_v21 = vmax.f32 %v750_v8, 0.0 }
 0x25b   : > { %v652_v22 = vmax.f32 %v650_v0, %v651_v11  ;;  %v769_v23 = vrot.slane %v768_v12, 1  ;;  %v658_v24 = vrot.slane %v657_v14, 1  ;;  %v775_v25 = vmax.f32 %v773_v3, %v774_v15 }
 0x25c   : > { %v661_v26 = vrot.slane %v660_v18, 4  ;;  %v778_v27 = vsel %vm763_vm11, %v757_v19, -inf  ;;  %v668_v28 = vrot.slane %v667_v20, 4  ;;  %v785_v30 = vsel %vm763_vm11, %v758_v21, -inf }
 0x25d   : > { %v770_v31 = vmax.f32 %v768_v12, %v769_v23  ;;  %v659_v32 = vmax.f32 %v657_v14, %v658_v24  ;;  %v776_v33 = vrot.slane %v775_v25, 1  ;;  %v779_v34 = vrot.slane %v778_v27, 4 }
 0x25e   : > { %v662_v36 = vmax.f32 %v660_v18, %v661_v26  ;;  %v669_v37 = vmax.f32 %v667_v20, %v668_v28  ;;  %v786_v38 = vrot.slane %v785_v30, 4  ;;  %v604_v40 = vrot.slane %v510_v4, 1  ;;  %v518_v42 = vpop.f32.mrb[12].mxu1 }
 0x25f   : > { %v820_v43 = vadd.f32 %v770_v31, %v652_v22  ;;  %v777_v44 = vmax.f32 %v775_v25, %v776_v33  ;;  %v780_v45 = vmax.f32 %v778_v27, %v779_v34  ;;  %v605_v47 = vrot.slane %v514_v16, 1  ;;  %v520_v48 = vpop.f32.mrb[13].mxu1 }
 0x260   : > { %v663_v49 = vrot.slane %v662_v36, 2  ;;  %v670_v50 = vrot.slane %v669_v37, 2  ;;  %v787_v51 = vmax.f32 %v785_v30, %v786_v38  ;;  %v620_v53 = vadd.f32 %v604_v40, %v508_v63  ;;  %v1435_v55 = vpop.f32.mrb[14].mxu1 }
 0x261   : > { %v828_v56 = vpack.c.bf16 %v820_v43, %v820_v43  ;;  %v821_v57 = vadd.f32 %v777_v44, %v659_v32  ;;  %v781_v58 = vrot.slane %v780_v45, 2  ;;  %v621_v59 = vadd.f32 %v605_v47, %v512_v10  ;;  %v1437_v60 = vpop.f32.mrb[15].mxu1 }
 0x262   : > { %v664_v61 = vmax.f32 %v662_v36, %v663_v49  ;;  %v671_v62 = vmax.f32 %v669_v37, %v670_v50  ;;  %v788_v0 = vrot.slane %v787_v51, 2  ;;  %v633_v1 = vadd.f32 %v1401_v9, %v620_v53 }
 0x263   : > { %v872_v2 = vunpack.c.l.b16 %v828_v56  ;;  %v829_v3 = vpack.c.bf16 %v821_v57, %v821_v57  ;;  %v1441_v4 = vsel %vm880_vm12, %v821_v57, %v820_v43  ;;  %v782_v5 = vmax.f32 %v780_v45, %v781_v58 }
 0x264   : > { %v665_v63 = vrot.slane %v664_v61, 1  ;;  %v672_v6 = vrot.slane %v671_v62, 1  ;;  %v789_v7 = vmax.f32 %v787_v51, %v788_v0  ;;  %v641_v8 = vmax.f32 %v633_v1, 0.0 }
 0x265   : > { %v873_v11 = vunpack.c.l.b16 %v829_v3  ;;  %v783_v12 = vrot.slane %v782_v5, 1  ;;  %v738_v10 = vadd.f32 %v722_v52, %v620_v53  ;;  %v634_v14 = vadd.f32 %v1401_v9, %v621_v59 }
 0x266   : > { %v666_v15 = vmax.f32 %v664_v61, %v665_v63  ;;  %v673_v16 = vmax.f32 %v671_v62, %v672_v6  ;;  %v790_v18 = vrot.slane %v789_v7, 1  ;;  %v674_v19 = vsel %vm645_vm10, %v641_v8, -inf }
 0x267   : > { %v881_v20 = vsel %vm880_vm12, %v873_v11, %v872_v2  ;;  %v784_v21 = vmax.f32 %v782_v5, %v783_v12  ;;  %v675_v22 = vrot.slane %v674_v19, 4  ;;  %v751_v23 = vadd.f32 %v1406_v17, %v738_v10 }
 0x268   : > { %v791_v24 = vmax.f32 %v789_v7, %v790_v18  ;;  %v642_v25 = vmax.f32 %v634_v14, 0.0  ;;  %v739_v35 = vadd.f32 %v723_v54, %v621_v59  ;;  %v606_v52 = vrot.slane %v520_v48, 1 }
 0x269   : > { %v822_v26 = vadd.f32 %v784_v21, %v666_v15  ;;  %v676_v27 = vmax.f32 %v674_v19, %v675_v22  ;;  %v759_v28 = vmax.f32 %v751_v23, 0.0  ;;  %v607_v30 = vrot.slane %v1437_v60, 1 }
 0x26a   : > { %v823_v31 = vadd.f32 %v791_v24, %v673_v16  ;;  %v681_v32 = vsel %vm645_vm10, %v642_v25, -inf  ;;  %v752_v33 = vadd.f32 %v1406_v17, %v739_v35  ;;  %v622_v34 = vadd.f32 %v606_v52, %v518_v42 }
 0x26b   : > { %v830_v36 = vpack.c.bf16 %v822_v26, %v822_v26  ;;  %v677_v37 = vrot.slane %v676_v27, 2  ;;  %v792_v38 = vsel %vm763_vm11, %v759_v28, -inf  ;;  %v682_v40 = vrot.slane %v681_v32, 4 }
 0x26c   : > { %v831_v43 = vpack.c.bf16 %v823_v31, %v823_v31  ;;  %v793_v46 = vrot.slane %v792_v38, 4  ;;  %v760_v54 = vmax.f32 %v752_v33, 0.0  ;;  %v635_v44 = vadd.f32 %v1401_v9, %v622_v34 }
 0x26d   : > { %v874_v45 = vunpack.c.l.b16 %v830_v36  ;;  %v678_v47 = vmax.f32 %v676_v27, %v677_v37  ;;  %v683_v48 = vmax.f32 %v681_v32, %v682_v40  ;;  %v740_v49 = vadd.f32 %v724_v39, %v622_v34 }
 0x26e   : > { %v875_v50 = vunpack.c.l.b16 %v831_v43  ;;  %v794_v51 = vmax.f32 %v792_v38, %v793_v46  ;;  %v799_v42 = vsel %vm763_vm11, %v760_v54, -inf  ;;  %v643_v53 = vmax.f32 %v635_v44, 0.0 }
 0x26f   : > { %v883_v56 = vsel %vm882_vm13, %v874_v45, %v881_v20  ;;  %v725_v57 = vrot.slane %v1418_v41, 2  ;;  %v684_v58 = vrot.slane %v683_v48, 2  ;;  %v800_v59 = vrot.slane %v799_v42, 4 }
 0x270   : > { %v885_v60 = vsel %vm884_vm14, %v875_v50, %v883_v56  ;;  %v795_v61 = vrot.slane %v794_v51, 2  ;;  %v688_v62 = vsel %vm645_vm10, %v643_v53, -inf  ;;  %v753_v0 = vadd.f32 %v1406_v17, %v740_v49 }
 0x271   : > { %v679_v29 = vrot.slane %v678_v47, 1  ;;  %v685_v39 = vmax.f32 %v683_v48, %v684_v58  ;;  %v801_v1 = vmax.f32 %v799_v42, %v800_v59  ;;  %v689_v2 = vrot.slane %v688_v62, 4 }
 0x272   : > { %v796_v3 = vmax.f32 %v794_v51, %v795_v61  ;;  %v761_v5 = vmax.f32 %v753_v0, 0.0  ;;  %v623_v63 = vadd.f32 %v607_v30, %v1435_v55  ;;  %v1035_v41 = vsel %vm882_vm13, %v822_v26, %v1441_v4 }
 0x273   : > { %v802_v6 = vrot.slane %v801_v1, 2  ;;  %v690_v7 = vmax.f32 %v688_v62, %v689_v2  ;;  %v1036_v8 = vsel %vm884_vm14, %v823_v31, %v1035_v41  ;;  %v686_v15 = vrot.slane %v685_v39, 1 }
 0x274   : > { %v797_v11 = vrot.slane %v796_v3, 1  ;;  %v806_v12 = vsel %vm763_vm11, %v761_v5, -inf  ;;  %v636_v10 = vadd.f32 %v1401_v9, %v623_v63  ;;  %v741_v14 = vadd.f32 %v725_v57, %v623_v63 }
 0x275   : > { %v803_v16 = vmax.f32 %v801_v1, %v802_v6  ;;  %v691_v18 = vrot.slane %v690_v7, 2  ;;  %v807_v19 = vrot.slane %v806_v12, 4  ;;  %v680_v20 = vmax.f32 %v678_v47, %v679_v29 }
 0x276   : > { %v798_v21 = vmax.f32 %v796_v3, %v797_v11  ;;  %v644_v55 = vmax.f32 %v636_v10, 0.0  ;;  %v754_v22 = vadd.f32 %v1406_v17, %v741_v14  ;;  %v687_v26 = vmax.f32 %v685_v39, %v686_v15 }
 0x277   : > { %v804_v4 = vrot.slane %v803_v16, 1  ;;  %v692_v23 = vmax.f32 %v690_v7, %v691_v18  ;;  %v808_v24 = vmax.f32 %v806_v12, %v807_v19  ;;  %v855_v41 = vshrl.u32 %v261_v13, 7  ;;  %v852_v7 = vld [vmem:[%s1500_s5] ss:$4 sm:$0x3] }
 0x278   : > { %v824_v25 = vadd.f32 %v798_v21, %v680_v20  ;;  %v695_v35 = vsel %vm645_vm10, %v644_v55, -inf  ;;  %v762_v52 = vmax.f32 %v754_v22, 0.0 }
 0x279   : > { %v805_v9 = vmax.f32 %v803_v16, %v804_v4  ;;  %v809_v27 = vrot.slane %v808_v24, 2  ;;  %v696_v28 = vrot.slane %v695_v35, 4  ;;  %v693_v17 = vrot.slane %v692_v23, 1 }
 0x27a   : > { %v832_v30 = vpack.c.bf16 %v824_v25, %v824_v25  ;;  %v813_v31 = vsel %vm763_vm11, %v762_v52, -inf  ;;  %v1037_v32 = vsel %vm886_vm15, %v824_v25, %v1036_v8  ;;  %v856_v6 = vsub.s32 0, %v855_v41  ;;  %v1159_v25 = vld [vmem:[%s1500_s5 + $0x1] ss:$0 sm:$0xff] }
 0x27b   : > { %v825_v33 = vadd.f32 %v805_v9, %v687_v26  ;;  %v810_v34 = vmax.f32 %v808_v24, %v809_v27  ;;  %v697_v36 = vmax.f32 %v695_v35, %v696_v28  ;;  %v814_v38 = vrot.slane %v813_v31, 4  ;;  %v1160_v26 = vld [vmem:[%s1500_s5 + $0x2] ss:$0 sm:$0xff] }
 0x27c   : > { %v876_v37 = vunpack.c.l.b16 %v832_v30  ;;  %v694_v48 = vmax.f32 %v692_v23, %v693_v17  ;;  %v860_v8 = vsub.s32 1, %v855_v41  ;;  %v857_v11 = vrot.slane %v852_v7, %v856_v6 }
 0x27d   : > { %v833_v40 = vpack.c.bf16 %v825_v33, %v825_v33  ;;  %v811_v43 = vrot.slane %v810_v34, 1  ;;  %v698_v46 = vrot.slane %v697_v36, 2  ;;  %v1038_v54 = vsel %vm888_vm0, %v825_v33, %v1037_v32 }
 0x27e   : > { %v815_v44 = vmax.f32 %v813_v31, %v814_v38  ;;  %v887_v45 = vsel %vm886_vm15, %v876_v37, %v885_v60  ;;  %v861_v12 = vrot.slane %v852_v7, %v860_v8 }
 0x27f   : > { %v877_v47 = vunpack.c.l.b16 %v833_v40  ;;  %v812_v49 = vmax.f32 %v810_v34, %v811_v43  ;;  %v699_v50 = vmax.f32 %v697_v36, %v698_v46 }
 0x280   : > { %v816_v51 = vrot.slane %v815_v44, 2 }
 0x281   : > { %v826_v42 = vadd.f32 %v812_v49, %v694_v48  ;;  %v889_v53 = vsel %vm888_vm0, %v877_v47, %v887_v45  ;;  %v700_v56 = vrot.slane %v699_v50, 1 }
 0x282   : > { %v817_v57 = vmax.f32 %v815_v44, %v816_v51 }
 0x283   : > { %v834_v58 = vpack.c.bf16 %v826_v42, %v826_v42  ;;  %v1039_v59 = vsel %vm890_vm1, %v826_v42, %v1038_v54  ;;  %v701_v0 = vmax.f32 %v699_v50, %v700_v56 }
 0x284   : > { %v818_v61 = vrot.slane %v817_v57, 1 }
 0x285   : > { %v878_v62 = vunpack.c.l.b16 %v834_v58 }
 0x286   : > { %v819_v29 = vmax.f32 %v817_v57, %v818_v61 }
 0x287   : > { %v891_v39 = vsel %vm890_vm1, %v878_v62, %v889_v53 }
 0x288   : > { %v827_v60 = vadd.f32 %v819_v29, %v701_v0 }
 0x28a   : > { %v835_v1 = vpack.c.bf16 %v827_v60, %v827_v60  ;;  %v1040_v2 = vsel %vm892_vm2, %v827_v60, %v1039_v59 }
 0x28c   : > { %v879_v3 = vunpack.c.l.b16 %v835_v1 }
 0x28e   : > { %v893_v5 = vsel %vm892_vm2, %v879_v3, %v891_v39 }
 0x28f   : > { %v894_v63 = vpack.c.b16 %v893_v5, %v893_v5 }
 0x291   : > { %1009 = vmatmul.mubr.bf16.vlgmr.msra.gmra.mrb[16].mxu1 %v894_v63 }
 0x364   : > { %v1010_v10 = vpop.f32.mrb[16].mxu1 }
 0x365   : > { %v1011_v14 = vadd.f32 %v1010_v10, %v857_v11  ;;  %v1012_v15 = vpop.f32.mrb[17].mxu1 }
 0x366   : > { %v1013_v16 = vadd.f32 %v1012_v15, %v861_v12  ;;  %v1014_v18 = vpop.f32.mrb[18].mxu1 }
 0x367   : > { %v1017_v19 = vmax.f32 %v1011_v14, 0.0  ;;  %v1015_v20 = vpop.f32.mrb[19].mxu1 }
 0x368   : > { %v1158_v21 = vmul.f32 -1.442695, %v1013_v16 }
 0x369   : > { %v1025_v55 = vsub.f32 1.0, %v1017_v19 }
 0x36a   : > { %1246 = vpow2.f32 %v1158_v21 }
 0x36b   : > { %v1042_v13 = vmul.f32 %v1040_v2, %v1025_v55 }
 0x374   : > { %v1247_v22 = vpop.eup %1246 }
 0x375   : > { %v1021_v4 = vadd.f32 1.0, %v1247_v22 }
 0x377   : > { %1248 = vrcp.f32 %v1021_v4 }
 0x381   : > { %v1249_v23 = vpop.eup %1248 }
 0x382   : > { %v1024_v24 = vmul.f32 %v1249_v23, %v1017_v19 }
 0x384   : > { %v1043_v35 = vadd.f32 %v1042_v13, %v1024_v24 }
 0x386   : > { %v1050_v52 = vmul.f32 %v1159_v25, %v1043_v35 }
 0x388   : > { %1051 = vadd.xlane.f32.xlu0 %v1050_v52 }
 0x415   : > { %v1052_v9 = vpop.xlane.xlu0 %1051 }
 0x416   : > { %v1057_v27 = vadd.f32 %v1160_v26, %v1052_v9 }
 0x418   : > { %1059 = vst.msk [vmem:[%s251_s19] sm:$0xff] %vm1058_vm3, %v1057_v27 }
 0x419 PF: > { %s16_s21 = sadd.s32 1, %s1256_s21  }
 0x41a   : > { %p13_p5 = scmp.ge.s32.totalorder %s16_s21, 4  }
 0x41c   :  { %15 = sbr.rel (!%p13_p5) target bundleno = 1 (0x1), region = 74 }

</bundles_post_ra>
